<compile_context>
chip_gen: v6e
topology: v6e:2x2x1
jax: 0.10.0
libtpu: 0.0.40
codegen_flags: <defaults>
</compile_context>

<pallas_src>
import functools

import jax
import jax.numpy as jnp
from jax import lax
from jax.experimental import pallas as pl
from jax.experimental.pallas import tpu as pltpu

_MIB = 1024 * 1024


# ---------------------------------------------------------------------------
# Kernels
# ---------------------------------------------------------------------------

def _sigmoid_f32(z):
    # Exact sigmoid; only (N, C) values flow through this, so it is free.
    return 1.0 / (1.0 + jnp.exp(-z))


def _se_fused_kernel(x_ref, w1_ref, b1_ref, w2_ref, b2_ref, o_ref):
    # x_ref: (nb, C, HW)   w1_ref: (C, Cr)  b1_ref: (1, Cr)
    # w2_ref: (Cr, C)      b2_ref: (1, C)   o_ref: (nb, C, HW)
    x = x_ref[...]                                              # native dtype slab
    # Squeeze: global average pool (f32 accumulation; no f32 copy of the slab kept).
    pooled = jnp.mean(x, axis=-1, dtype=jnp.float32)            # (nb, C)
    # Excitation: two tiny channel FCs (negligible FLOPs, hidden under the DMA).
    y1 = jnp.dot(pooled, w1_ref[...],
                 preferred_element_type=jnp.float32) + b1_ref[...]
    y1 = jnp.maximum(y1, 0.0)
    y2 = jnp.dot(y1, w2_ref[...],
                 preferred_element_type=jnp.float32) + b2_ref[...]
    scale = _sigmoid_f32(y2)                                    # (nb, C) f32
    # Intentional: the big rescale multiply stays in the input dtype (bf16 stays
    # bf16); only the tiny pooled/FC/sigmoid math runs in f32.
    o_ref[...] = (x * scale.astype(x.dtype)[:, :, None]).astype(o_ref.dtype)


def _se_scale_kernel(x_ref, w1_ref, b1_ref, w2_ref, b2_ref, scale_ref, acc_ref,
                     *, inv_hw, hw, thw, mask_tail):
    # Pass 1 of the HW-tiled variant.
    # x_ref: (1, C, thw); scale_ref: (1, C, 1); acc_ref: VMEM (1, C) f32.
    k = pl.program_id(1)

    @pl.when(k == 0)
    def _():
        acc_ref[...] = jnp.zeros_like(acc_ref)

    x = x_ref[...]
    if mask_tail:
        # Ragged final HW tile: zero out the out-of-range columns before the sum
        # (Pallas pads boundary reads with unspecified values).
        col = k * thw + lax.broadcasted_iota(jnp.int32, x.shape, x.ndim - 1)
        x = jnp.where(col < hw, x, 0)
    acc_ref[...] += jnp.sum(x, axis=-1, dtype=jnp.float32)

    @pl.when(k == pl.num_programs(1) - 1)
    def _():
        pooled = acc_ref[...] * inv_hw                          # mean over true HW
        y1 = jnp.dot(pooled, w1_ref[...],
                     preferred_element_type=jnp.float32) + b1_ref[...]
        y1 = jnp.maximum(y1, 0.0)
        y2 = jnp.dot(y1, w2_ref[...],
                     preferred_element_type=jnp.float32) + b2_ref[...]
        scale_ref[...] = _sigmoid_f32(y2)[:, :, None].astype(scale_ref.dtype)


def _se_rescale_kernel(x_ref, s_ref, o_ref):
    # Pass 2 of the HW-tiled variant: x * per-channel scale, in native dtype.
    # Out-of-range columns of a ragged final tile are clipped at store time.
    x = x_ref[...]                                              # (1, C, thw)
    o_ref[...] = (x * s_ref[...].astype(x.dtype)).astype(o_ref.dtype)


# ---------------------------------------------------------------------------
# Hardware-aware sizing helpers
# ---------------------------------------------------------------------------

def _vmem_budget_and_cores():
    """Generation-aware VMEM budget, scoped-VMEM limit and TensorCore count."""
    cap = None
    try:
        info = pltpu.get_tpu_info()
        for attr in ("vmem_capacity_bytes", "vmem_size_bytes", "vmem_bytes"):
            v = getattr(info, attr, None)
            if v:
                cap = int(v)
                break
    except Exception:
        cap = None
    if cap is None:
        cap = 64 * _MIB                     # conservative (v7x-sized) fallback
    # v7x exposes 64 MiB VMEM per core and has 2 TensorCores; v5e/v6e: 128 MiB, 1 TC.
    num_tc = 2 if cap <= 64 * _MIB else 1
    budget = int(0.72 * cap)                # ~46 MiB on v7x, ~92 MiB on v5e/v6e
    vmem_limit = int(min(cap - 2 * _MIB, budget + 8 * _MIB))  # buffers + weights/scratch headroom
    return budget, vmem_limit, num_tc


def _pick_nb(n, cap, num_tc):
    """Largest batch block <= cap that divides n (no padding, no ragged batch).

    On a 2-TC chip prefer a grid-step count that is a multiple of num_tc (and keep
    >= 4 steps when the batch allows it) so both TensorCores get balanced work; on
    1-TC chips keep only a small step floor for DMA/compute pipelining.
    """
    cap = max(1, min(int(cap), n))
    steps_floor = 4 if num_tc >= 2 else 3
    if n >= steps_floor:
        cap = min(cap, max(1, n // steps_floor))
    divisors = [d for d in range(1, cap + 1) if n % d == 0]
    if num_tc >= 2:
        balanced = [d for d in divisors if (n // d) % num_tc == 0]
        if balanced:
            return max(balanced)
    return max(divisors)


def _prep_weights(w1, b1, w2, b2):
    Cr, C = w1.shape
    # 1x1 convs are channel matmuls; pass transposed so the kernel does
    # (nb, C) @ (C, Cr) and (nb, Cr) @ (Cr, C). Biases as 2-D rows.
    return (jnp.transpose(w1), b1.reshape(1, Cr),
            jnp.transpose(w2), b2.reshape(1, C))


# ---------------------------------------------------------------------------
# Wrappers
# ---------------------------------------------------------------------------

def _se_layer_fused(x_nchw, w1, b1, w2, b2, *, budget, vmem_limit, num_tc):
    N, C, H, W = x_nchw.shape
    Cr = w1.shape[0]
    HW = H * W
    itemsize = x_nchw.dtype.itemsize
    per_image = C * HW * itemsize

    # Double-buffered input + double-buffered output ~= 4 resident blocks;
    # also aim for >= ~16 MiB streaming blocks where the batch allows it.
    cap_budget = max(1, budget // (4 * per_image))
    cap_target = max(1, (16 * _MIB) // per_image)
    nb = _pick_nb(N, min(cap_budget, cap_target), num_tc)

    # TODO(synk): for HW not a multiple of 128, collapsing (C, HW) -> C*HW would give
    # lane-dense stores but needs a lane-splitting in-kernel reshape that Mosaic does
    # not reliably lower; the always-lowering (nb, C, HW) layout is kept for now.
    x = x_nchw.reshape(N, C, HW)                       # free metadata reshape
    w1_t, b1_r, w2_t, b2_r = _prep_weights(w1, b1, w2, b2)

    cost = pl.CostEstimate(
        flops=int(3 * N * C * HW + 4 * N * C * Cr),
        transcendentals=int(N * C),
        bytes_accessed=int(2 * N * C * HW * itemsize + (2 * C * Cr + C + Cr) * 4),
    )

    out = pl.pallas_call(
        _se_fused_kernel,
        out_shape=jax.ShapeDtypeStruct((N, C, HW), x.dtype),
        grid_spec=pltpu.PrefetchScalarGridSpec(
            num_scalar_prefetch=0,
            grid=(N // nb,),
            in_specs=[
                pl.BlockSpec((nb, C, HW), lambda n: (n, 0, 0)),
                pl.BlockSpec((C, Cr), lambda n: (0, 0)),
                pl.BlockSpec((1, Cr), lambda n: (0, 0)),
                pl.BlockSpec((Cr, C), lambda n: (0, 0)),
                pl.BlockSpec((1, C), lambda n: (0, 0)),
            ],
            out_specs=pl.BlockSpec((nb, C, HW), lambda n: (n, 0, 0)),
        ),
        compiler_params=pltpu.CompilerParams(
            dimension_semantics=("parallel",),
            vmem_limit_bytes=vmem_limit,
        ),
        cost_estimate=cost,
    )(x, w1_t, b1_r, w2_t, b2_r)

    return out.reshape(N, C, H, W)


def _se_layer_hw_tiled(x_nchw, w1, b1, w2, b2, *, budget, vmem_limit, hw_tile=None):
    N, C, H, W = x_nchw.shape
    Cr = w1.shape[0]
    HW = H * W
    itemsize = x_nchw.dtype.itemsize

    # Lane-dense HW tile (multiple of 128). Depth-2 double buffering on pass-2's
    # input and output => ~4 resident copies of the x tile.
    if hw_tile is None:
        thw_cap = max(128, (budget // (4 * C * itemsize)) // 128 * 128)
    else:
        thw_cap = max(128, (int(hw_tile) // 128) * 128)

    best_div = 0
    for t in range(128, min(thw_cap, HW) + 1, 128):
        if HW % t == 0:
            best_div = t                                # largest 128-multiple dividing HW
    if best_div:
        thw, mask_tail = best_div, False                # no ragged tail, no masking
    else:
        thw = min(thw_cap, pl.cdiv(HW, 128) * 128)
        mask_tail = (HW % thw) != 0
    if thw >= HW:
        thw, mask_tail = HW, False
    kh = pl.cdiv(HW, thw)

    x = x_nchw.reshape(N, C, HW)                        # free metadata reshape; no pad
    w1_t, b1_r, w2_t, b2_r = _prep_weights(w1, b1, w2, b2)

    # -------- Pass 1: HW-tiled squeeze + excitation -> per-image channel scale.
    scale = pl.pallas_call(
        functools.partial(_se_scale_kernel, inv_hw=1.0 / HW, hw=HW, thw=thw,
                          mask_tail=mask_tail),
        out_shape=jax.ShapeDtypeStruct((N, C, 1), jnp.float32),
        grid_spec=pltpu.PrefetchScalarGridSpec(
            num_scalar_prefetch=0,
            grid=(N, kh),
            in_specs=[
                pl.BlockSpec((1, C, thw), lambda n, k: (n, 0, k)),
                pl.BlockSpec((C, Cr), lambda n, k: (0, 0)),
                pl.BlockSpec((1, Cr), lambda n, k: (0, 0)),
                pl.BlockSpec((Cr, C), lambda n, k: (0, 0)),
                pl.BlockSpec((1, C), lambda n, k: (0, 0)),
            ],
            out_specs=pl.BlockSpec((1, C, 1), lambda n, k: (n, 0, 0)),
            scratch_shapes=[pltpu.VMEM((1, C), jnp.float32)],
        ),
        compiler_params=pltpu.CompilerParams(
            dimension_semantics=("parallel", "arbitrary"),
            vmem_limit_bytes=vmem_limit,
        ),
        cost_estimate=pl.CostEstimate(
            flops=int(2 * N * C * HW + 4 * N * C * Cr),
            transcendentals=int(N * C),
            bytes_accessed=int(N * C * HW * itemsize + N * C * 4),
        ),
    )(x, w1_t, b1_r, w2_t, b2_r)

    # -------- Pass 2: re-read x per HW tile and apply the channel scale.
    out = pl.pallas_call(
        _se_rescale_kernel,
        out_shape=jax.ShapeDtypeStruct((N, C, HW), x.dtype),
        grid_spec=pltpu.PrefetchScalarGridSpec(
            num_scalar_prefetch=0,
            grid=(N, kh),
            in_specs=[
                pl.BlockSpec((1, C, thw), lambda n, k: (n, 0, k)),
                pl.BlockSpec((1, C, 1), lambda n, k: (n, 0, 0)),
            ],
            out_specs=pl.BlockSpec((1, C, thw), lambda n, k: (n, 0, k)),
        ),
        compiler_params=pltpu.CompilerParams(
            dimension_semantics=("parallel", "parallel"),
            vmem_limit_bytes=vmem_limit,
        ),
        cost_estimate=pl.CostEstimate(
            flops=int(N * C * HW),
            transcendentals=0,
            bytes_accessed=int(2 * N * C * HW * itemsize),
        ),
    )(x, scale)

    return out.reshape(N, C, H, W)


def se_layer(x_nchw, w1, b1, w2, b2, *, hw_tile=None, force_hw_tiled=False):
    """SELayer forward. x_nchw: (N,C,H,W); w1:(Cr,C); b1:(Cr,); w2:(C,Cr); b2:(C,)."""
    N, C, H, W = x_nchw.shape
    budget, vmem_limit, num_tc = _vmem_budget_and_cores()
    per_image = C * H * W * x_nchw.dtype.itemsize
    # Fused single pass (2x HBM traffic) whenever a double-buffered single-image
    # slab fits the generation-aware budget; otherwise the two-pass HW-tiled form.
    if force_hw_tiled or 4 * per_image > budget:
        return _se_layer_hw_tiled(x_nchw, w1, b1, w2, b2, budget=budget,
                                  vmem_limit=vmem_limit, hw_tile=hw_tile)
    return _se_layer_fused(x_nchw, w1, b1, w2, b2, budget=budget,
                           vmem_limit=vmem_limit, num_tc=num_tc)


def se_layer_ref(x_nchw, w1, b1, w2, b2):
    """Pure-JAX reference matching the PyTorch forward."""
    pooled = jnp.mean(x_nchw, axis=(2, 3))                      # (N, C)
    y1 = jnp.maximum(pooled @ w1.T + b1, 0.0)                   # (N, Cr)
    y2 = jax.nn.sigmoid(y1 @ w2.T + b2)                         # (N, C)
    return x_nchw * y2[:, :, None, None]


if __name__ == "__main__":
    # SELayer(channel=32, reduction=16) -> hidden channels = 2
    N, C = 2, 32
    reduction = 16
    Cr = C // reduction

    key = jax.random.PRNGKey(0)
    kx, k1, k2, k3, k4, kx2 = jax.random.split(key, 6)

    # conv_du[0]: Conv2d(C, C//r, 1) -> weight (Cr, C), bias (Cr,)
    w1 = jax.random.normal(k1, (Cr, C), dtype=jnp.float32) * 0.1
    b1 = jax.random.normal(k2, (Cr,), dtype=jnp.float32) * 0.1
    # conv_du[2]: Conv2d(C//r, C, 1) -> weight (C, Cr), bias (C,)
    w2 = jax.random.normal(k3, (C, Cr), dtype=jnp.float32) * 0.1
    b2 = jax.random.normal(k4, (C,), dtype=jnp.float32) * 0.1

    tol = dict(atol=1e-3, rtol=1e-3)

    # ---- Case 1: HW multiple of 128 (16x16) -> fused path + forced tiled path.
    x = jax.random.normal(kx, (N, C, 16, 16), dtype=jnp.float32)
    ref = se_layer_ref(x, w1, b1, w2, b2)

    out = jax.block_until_ready(se_layer(x, w1, b1, w2, b2))
    assert out.shape == x.shape
    err = float(jnp.max(jnp.abs(out - ref)))
    assert jnp.allclose(out, ref, **tol), "fused path mismatch, max abs err %e" % err

    out_t = jax.block_until_ready(
        se_layer(x, w1, b1, w2, b2, force_hw_tiled=True, hw_tile=128))
    err_t = float(jnp.max(jnp.abs(out_t - ref)))
    assert jnp.allclose(out_t, ref, **tol), "tiled path mismatch, max abs err %e" % err_t

    # ---- Case 2: HW not a multiple of 128 (20x20 -> 400) -> exercises the fused
    # path at a non-aligned HW and the ragged-tail masking in the tiled path.
    x2 = jax.random.normal(kx2, (N, C, 20, 20), dtype=jnp.float32)
    ref2 = se_layer_ref(x2, w1, b1, w2, b2)

    out2 = jax.block_until_ready(se_layer(x2, w1, b1, w2, b2))
    err2 = float(jnp.max(jnp.abs(out2 - ref2)))
    assert jnp.allclose(out2, ref2, **tol), "fused ragged-HW mismatch, max abs err %e" % err2

    out2_t = jax.block_until_ready(
        se_layer(x2, w1, b1, w2, b2, force_hw_tiled=True, hw_tile=128))
    err2_t = float(jnp.max(jnp.abs(out2_t - ref2)))
    assert jnp.allclose(out2_t, ref2, **tol), \
        "tiled ragged-HW mismatch, max abs err %e" % err2_t

    print("KERNEL_OK")
</pallas_src>

<mosaic_0001>
module attributes {stable_mosaic.version = 11 : i64} {
  func.func @_se_fused_kernel(%arg0: i32, %arg1: memref<1x32x256xf32, #tpu.memory_space<vmem>>, %arg2: memref<32x2xf32, #tpu.memory_space<vmem>>, %arg3: memref<1x2xf32, #tpu.memory_space<vmem>>, %arg4: memref<2x32xf32, #tpu.memory_space<vmem>>, %arg5: memref<1x32xf32, #tpu.memory_space<vmem>>, %arg6: memref<1x32x256xf32, #tpu.memory_space<vmem>>) attributes {dimension_semantics = [#tpu.dimension_semantics<parallel>], iteration_bounds = array<i64: 2>, scalar_prefetch = 0 : i64, scratch_operands = 0 : i64, tpu.core_type = #tpu.core_type<tc>, window_params = [{transform_indices = @transform_0, window_bounds = array<i64: 1, 32, 256>}, {pipeline_mode = #tpu.pipeline_mode<synchronous>, transform_indices = @transform_1, window_bounds = array<i64: 32, 2>}, {pipeline_mode = #tpu.pipeline_mode<synchronous>, transform_indices = @transform_2, window_bounds = array<i64: 1, 2>}, {pipeline_mode = #tpu.pipeline_mode<synchronous>, transform_indices = @transform_3, window_bounds = array<i64: 2, 32>}, {pipeline_mode = #tpu.pipeline_mode<synchronous>, transform_indices = @transform_4, window_bounds = array<i64: 1, 32>}, {transform_indices = @transform_5, window_bounds = array<i64: 1, 32, 256>}]} {
    %c0 = arith.constant 0 : index
    %c0_0 = arith.constant 0 : index
    %c0_1 = arith.constant 0 : index
    %0 = vector.load %arg1[%c0, %c0_0, %c0_1] : memref<1x32x256xf32, #tpu.memory_space<vmem>>, vector<1x32x256xf32>
    %cst = arith.constant dense<0.000000e+00> : vector<1x32xf32>
    %1 = vector.multi_reduction <add>, %0, %cst [2] : vector<1x32x256xf32> to vector<1x32xf32>
    %cst_2 = arith.constant 2.560000e+02 : f32
    %2 = vector.broadcast %cst_2 : f32 to vector<1x32xf32>
    %3 = arith.divf %1, %2 : vector<1x32xf32>
    %c0_3 = arith.constant 0 : index
    %c0_4 = arith.constant 0 : index
    %4 = vector.load %arg2[%c0_3, %c0_4] : memref<32x2xf32, #tpu.memory_space<vmem>>, vector<32x2xf32>
    %cst_5 = arith.constant dense<0.000000e+00> : vector<1x2xf32>
    %5 = tpu.matmul %3, %4, %cst_5 {dimension_numbers = #tpu.dot_dimension_numbers<[1], [0], [0], [1], [0, 0, 1, 1], [], []>} : vector<1x32xf32>, vector<32x2xf32>, vector<1x2xf32> -> vector<1x2xf32>
    %c0_6 = arith.constant 0 : index
    %c0_7 = arith.constant 0 : index
    %6 = vector.load %arg3[%c0_6, %c0_7] : memref<1x2xf32, #tpu.memory_space<vmem>>, vector<1x2xf32>
    %7 = arith.addf %5, %6 : vector<1x2xf32>
    %cst_8 = arith.constant 0.000000e+00 : f32
    %8 = vector.broadcast %cst_8 : f32 to vector<1x2xf32>
    %9 = arith.maximumf %7, %8 : vector<1x2xf32>
    %c0_9 = arith.constant 0 : index
    %c0_10 = arith.constant 0 : index
    %10 = vector.load %arg4[%c0_9, %c0_10] : memref<2x32xf32, #tpu.memory_space<vmem>>, vector<2x32xf32>
    %cst_11 = arith.constant dense<0.000000e+00> : vector<1x32xf32>
    %11 = tpu.matmul %9, %10, %cst_11 {dimension_numbers = #tpu.dot_dimension_numbers<[1], [0], [0], [1], [0, 0, 1, 1], [], []>} : vector<1x2xf32>, vector<2x32xf32>, vector<1x32xf32> -> vector<1x32xf32>
    %c0_12 = arith.constant 0 : index
    %c0_13 = arith.constant 0 : index
    %12 = vector.load %arg5[%c0_12, %c0_13] : memref<1x32xf32, #tpu.memory_space<vmem>>, vector<1x32xf32>
    %13 = arith.addf %11, %12 : vector<1x32xf32>
    %cst_14 = arith.constant 0.000000e+00 : f32
    %14 = vector.broadcast %cst_14 : f32 to vector<1x32xf32>
    %15 = arith.subf %14, %13 : vector<1x32xf32>
    %16 = math.exp %15 : vector<1x32xf32>
    %cst_15 = arith.constant 1.000000e+00 : f32
    %17 = vector.broadcast %cst_15 : f32 to vector<1x32xf32>
    %18 = arith.addf %17, %16 : vector<1x32xf32>
    %cst_16 = arith.constant 1.000000e+00 : f32
    %19 = vector.broadcast %cst_16 : f32 to vector<1x32xf32>
    %20 = arith.divf %19, %18 : vector<1x32xf32>
    %21 = vector.shape_cast %20 : vector<1x32xf32> to vector<1x32x1xf32>
    %22 = vector.broadcast %21 : vector<1x32x1xf32> to vector<1x32x256xf32>
    %23 = arith.mulf %0, %22 : vector<1x32x256xf32>
    %c0_17 = arith.constant 0 : index
    %c0_18 = arith.constant 0 : index
    %c0_19 = arith.constant 0 : index
    %24 = vector.load %arg6[%c0_17, %c0_18, %c0_19] : memref<1x32x256xf32, #tpu.memory_space<vmem>>, vector<1x32x256xf32>
    tpu.vector_store %arg6[%c0_17, %c0_18, %c0_19], %23 {strides = array<i32>} : memref<1x32x256xf32, #tpu.memory_space<vmem>>, vector<1x32x256xf32>,
    return
  }
  func.func @transform_0(%arg0: i32) -> (i32, i32, i32) {
    %c0_i32 = arith.constant 0 : i32
    %c0_i32_0 = arith.constant 0 : i32
    %c0_i32_1 = arith.constant 0 : i32
    return %arg0, %c0_i32, %c0_i32_0 : i32, i32, i32
  }
  func.func @transform_1(%arg0: i32) -> (i32, i32) {
    %c0_i32 = arith.constant 0 : i32
    %c0_i32_0 = arith.constant 0 : i32
    %c0_i32_1 = arith.constant 0 : i32
    return %c0_i32, %c0_i32_0 : i32, i32
  }
  func.func @transform_2(%arg0: i32) -> (i32, i32) {
    %c0_i32 = arith.constant 0 : i32
    %c0_i32_0 = arith.constant 0 : i32
    %c0_i32_1 = arith.constant 0 : i32
    return %c0_i32, %c0_i32_0 : i32, i32
  }
  func.func @transform_3(%arg0: i32) -> (i32, i32) {
    %c0_i32 = arith.constant 0 : i32
    %c0_i32_0 = arith.constant 0 : i32
    %c0_i32_1 = arith.constant 0 : i32
    return %c0_i32, %c0_i32_0 : i32, i32
  }
  func.func @transform_4(%arg0: i32) -> (i32, i32) {
    %c0_i32 = arith.constant 0 : i32
    %c0_i32_0 = arith.constant 0 : i32
    %c0_i32_1 = arith.constant 0 : i32
    return %c0_i32, %c0_i32_0 : i32, i32
  }
  func.func @transform_5(%arg0: i32) -> (i32, i32, i32) {
    %c0_i32 = arith.constant 0 : i32
    %c0_i32_0 = arith.constant 0 : i32
    %c0_i32_1 = arith.constant 0 : i32
    return %arg0, %c0_i32, %c0_i32_0 : i32, i32, i32
  }
}

</mosaic_0001>

<bundles_post_ra>
// kernel: tpu_custom_call.1
= control target key start
LH: loop header
LB: loop body
LE: loop exit
PB: predicated region body
PF: predicated region fallthrough
CT: control target
= control target key end

     0   :  { %10 = vsyncpa [#allocation3], 0  ;;  %s1027_s0 = inlined_call_operand.hbm [shape: f32[2,32,256], index: 0, kind: input, shape index: {}]   ;;  %s1028_s1 = inlined_call_operand.vmem [shape: f32[32,2], index: 1, kind: input, shape index: {}]   ;;  %s1029_s2 = inlined_call_operand.vmem [shape: f32[1,2], index: 2, kind: input, shape index: {}]   ;;  %s1030_s3 = inlined_call_operand.vmem [shape: f32[2,32], index: 3, kind: input, shape index: {}]   ;;  %s1031_s4 = inlined_call_operand.vmem [shape: f32[1,32], index: 4, kind: input, shape index: {}]   ;;  %s1032_s5 = inlined_call_operand.hbm [shape: f32[2,32,256], index: 5, kind: output, shape index: {}]  }
   0x1   :  { %12 = vsyncpa [#allocation3 + $0x1], 0 }
   0x2   :  { %13 = vsyncpa [#allocation4], 0 }
   0x3   :  { %15 = vsyncpa [#allocation4 + $0x1], 0  ;;  %s816_s18 = smov 0   ;;  %s818_s19 = smov 0  }
   0x4   :  { %s820_s20 = smov 0   ;;  %s822_s21 = smov 0  }
   0x5 LB: > { %s837_s22 = sadd.s32 4294967295, %s776_s21   ;;  %s586_s23 = sadd.s32 4294967294, %s776_s21   ;;  %s776_s21 = sphi %s822_s21, %s1047_s21   ;;  %s772_s20 = sphi %s820_s20, %s1046_s20   ;;  %s768_s19 = sphi %s818_s19, %s1045_s19   ;;  %s764_s18 = sphi %s816_s18, %s1044_s18  }
   0x6   : > { %s841_s24 = sadd.s32 1, %s776_s21   ;;  %s28_s25 = sadd.s32 1, %s772_s20 }
   0x7   : > { %s25_s26 = ssub.s32 %s776_s21, %s841_s24  ;;  %p35_p0 = scmp.ne.s32.totalorder %s772_s20, %s768_s19 }
   0x8   : > { %p26_p1 = scmp.eq.s32.totalorder %s25_s26, 0  ;;  %p36_p2 = scmp.eq.s32.totalorder %s776_s21, 0 }
   0x9   : > { %p41_p3 = scmp.ne.s32.totalorder %s768_s19, %s764_s18  ;;  %p42_p4 = scmp.eq.s32.totalorder %s837_s22, 0 }
   0xa   : > { %s853_s27 = scalar_select %p26_p1, %s772_s20, %s28_s25  }
   0xb   : > { %p855_p5 = por %p36_p2, %p35_p0  ;;  %p859_p6 = por %p42_p4, %p41_p3 }
   0xc   : > { %p149_p7 = scmp.eq.s32.totalorder %s837_s22, 1  ;;  %p155_p8 = scmp.eq.s32.totalorder %s586_s23, 1 }
   0xd   : > { %s1036_s29 = scalar_select %p859_p6, 1, 0 }
   0xe   : > { %p640_p10 = scmp.lt.s32.totalorder %s776_s21, 2  ;;  %p866_p11 = por %p149_p7, %p35_p0 }
   0xf   : > { %p870_p12 = por %p155_p8, %p41_p3  ;;  %s187_s7 = sand.u32 1, %s772_s20  }
  0x10   : > { %s1037_s30 = scalar_select %p866_p11, 1, 0 }
  0x11   : > { %s1038_s6 = scalar_select %p870_p12, 1, 0 }
  0x12   : > { %s603_s8 = sshll.u32 %s776_s21, 10  ;;  %s589_s9 = sshll.u32 %s187_s7, 6 }
  0x13   : > { %s879_s12 = scalar_lea.hbm %s1027_s0, %s603_s8  ;;  %s191_s13 = scalar_lea.vmem [#allocation2], %s589_s9 }
  0x14   : > { %s198_s14 = sshll.u32 %s191_s13, 4  ;;  %p883_p13 = pnand %p640_p10, %p855_p5  ;;  %s887_s14 = int_to_ptr.vmem [resolvable:$true] %s198_s14 }
  0x15   : > { %s889_s16 = scalar_lea.sflag [#allocation3], %s187_s7  ;;  %s684_s17 = scalar_lea.hbm %s879_s12, 1024 }
  0x16   : > { %p685_p0 = scmp.ne.s32.totalorder %s879_s12, %s684_s17  ;;  %p686_p1 = pneg %p883_p13 }
  0x17   : > { %s689_s26 = scalar_lea.hbm %s1027_s0, 2048  ;;  %p690_p4 = scmp.lt.s32.totalorder %s879_s12, %s1027_s0 }
  0x18   : > { %p687_p2 = pnand %p686_p1, %p685_p0  ;;  %p691_p5 = scmp.lt.s32.totalorder %s689_s26, %s684_s17 }
  0x1a   : > { %p688_p3 = pneg %p687_p2  ;;  %p692_p7 = por %p691_p5, %p690_p4 }
  0x1c   : > { %p693_p8 = pnand %p692_p7, %p688_p3 }
  0x1e   : > { %696 = shalt.err (!%p693_p8)
}
  0x1f   : > { %s697_s7 = scalar_lea.vmem %s887_s14, 1024  ;;  %s778_s9 = smov [#allocation2]  }
  0x20   : > { %p698_p10 = scmp.ne.s32.totalorder %s887_s14, %s697_s7  ;;  %s702_s10 = sshll.u32 %s778_s9, 4  ;;  %s703_s10 = int_to_ptr.vmem [resolvable:$false] %s702_s10 }
  0x21   : > { %s704_s11 = scalar_lea.vmem %s703_s10, 2048  ;;  %p705_p2 = scmp.lt.s32.totalorder %s887_s14, %s703_s10 }
  0x22   : > { %p700_p9 = pnand %p698_p10, %p686_p1  ;;  %p706_p12 = scmp.lt.s32.totalorder %s704_s11, %s697_s7 }
  0x24   : > { %p701_p0 = pneg %p700_p9  ;;  %p707_p11 = por %p706_p12, %p705_p2 }
  0x26   : > { %p708_p6 = pnand %p707_p11, %p701_p0 }
  0x28   : > { %711 = shalt.err (!%p708_p6)
}
  0x29   : > { %s779_s13 = smov 256   ;;  %s780_s17 = smov 16  }
  0x2a   : > { %635 = dma.hbm_to_vmem [thread:$0]  (!%p883_p13), %s879_s12, 1024, %s887_s14, %s889_s16, %s779_s13, %s779_s13, %s780_s17  }
  0x2b   : > { %p592_p9 = scmp.ge.s32.totalorder %s776_s21, 1  ;;  %p206_p1 = scmp.lt.s32.totalorder %s776_s21, 3 }
  0x2d   : > { %p207_p3 = pnand %p592_p9, %p206_p1 }
  0x2e   : > { %s913_s23 = sand.u32 (!%p207_p3), 1, %s768_s19   ;;  %p1040_p6 = scmp.ne.s32.totalorder (!%p207_p3), %s1036_s29, 0 }
  0x2f   : > { %210 = sbr.rel (%p207_p3) target bundleno = 772 (0x304), region = 40  ;;  %s593_s25 = sshll.u32 (!%p207_p3), %s913_s23, 6 }
  0x30   : > { %s213_s26 = scalar_lea.sflag (!%p207_p3), [#allocation3], %s913_s23  ;;  %s216_s28 = scalar_lea.vmem (!%p207_p3), [#allocation2], %s593_s25 }
  0x34   : > { %755 = dma.done.wait (%p1040_p6), %s213_s26, 1024  }
  0x35   : > { %757 = vsyncadd (%p1040_p6), %s213_s26, 4294966272  ;;  %v923_v0 = vld [vmem:[%s216_s28] sm:$0xff]  ;;  %v925_v1 = vld [vmem:[%s216_s28 + $0x8] sm:$0xff]  ;;  %v781_v12 = vmov 0.0   ;;  %vm782_vm0 = vmmov 0   ;;  %v277_v17 = vlaneseq  ;;  %vm288_vm1 = vcmask 130112  }
  0x36   : > { %v927_v2 = vld [vmem:[%s216_s28 + $0x20] sm:$0xff]  ;;  %v251_v3 = vadd.f32 %v925_v1, %v923_v0  ;;  %v931_v4 = vld [vmem:[%s216_s28 + $0x28] sm:$0xff]  ;;  %v933_v5 = vld [vmem:[%s216_s28 + $0x10] sm:$0xff]  ;;  %612 = vmatprep.subr.mxu0 %v781_v12  ;;  %623 = vmatprep.subr.mxu1 %v781_v12  ;;  %vm295_vm2 = vcmask 195712   ;;  %vm302_vm3 = vcmask 261312   ;;  %vm304_vm4 = vcmask 261120  }
  0x37   : > { %v935_v6 = vld [vmem:[%s216_s28 + $0x18] sm:$0xff]  ;;  %v257_v7 = vadd.f32 %v931_v4, %v927_v2  ;;  %v939_v8 = vld [vmem:[%s216_s28 + $0x30] sm:$0xff]  ;;  %v269_v15 = vld [vmem:[%s1028_s1 + $0x8] sm:$0xff]  ;;  %620 = vmatprep.mubr.msk.f32.mxu0 %vm782_vm0, %v781_v12  ;;  %625 = vmatprep.mubr.msk.f32.mxu1 %vm782_vm0, %v781_v12  ;;  %v278_v18 = vand.u32 127, %v277_v17  ;;  %v280_v19 = vshrl.u32 %v277_v17, 7  ;;  %vm384_vm5 = vcmask 1041408  }
  0x38   : > { %v941_v9 = vld [vmem:[%s216_s28 + $0x38] sm:$0xff]  ;;  %252 = vadd.xlane.f32.xlu0 %v251_v3  ;;  %v254_v10 = vadd.f32 %v935_v6, %v933_v5  ;;  %v270_v14 = vld [vmem:[%s1028_s1 + $0x10] sm:$0xff]  ;;  %v268_v16 = vld [vmem:[%s1028_s1] sm:$0xff]  ;;  %vm380_vm6 = vcmask 15360   ;;  %s242_s29 = scalar_lea.vmem [#allocation5], %s593_s25  ;;  %s604_s14 = sshll.u32 %s837_s22, 10 }
  0x39   : > { %258 = vadd.xlane.f32.xlu1 %v257_v7  ;;  %v260_v11 = vadd.f32 %v941_v9, %v939_v8  ;;  %v271_v13 = vld [vmem:[%s1028_s1 + $0x18] sm:$0xff]  ;;  %v283_v20 = vadd.s32 4294967288, %v278_v18  ;;  %v290_v22 = vadd.s32 4294967280, %v278_v18  ;;  %v297_v23 = vadd.s32 4294967272, %v278_v18  ;;  %v378_v42 = vld [vmem:[%s1030_s3] sm:$0x3]  ;;  %s982_s16 = scalar_lea.hbm %s1032_s5, %s604_s14 }
  0x3a   : > { %613 = vmatpush3.msra.mxu0 %v271_v13  ;;  %v281_v25 = vsub.s32 %v278_v18, %v280_v19  ;;  %624 = vmatpush3.msk.msra.mxu1 %vm384_vm5, %v378_v42  ;;  %v272_v43 = vld [vmem:[%s1029_s2] sm:$0x1]  ;;  %v466_v56 = vsub.s32 0, %v280_v19  ;;  %s513_s12 = sshll.u32 %s242_s29, 4  ;;  %s500_s22 = scalar_lea.sflag [#allocation4], %s913_s23  ;;  %s977_s12 = int_to_ptr.vmem [resolvable:$true] %s513_s12 }
  0x3b   : > { %614 = vmatprep.subr.mxu0 %v781_v12  ;;  %v286_v27 = vsub.s32 %v283_v20, %v280_v19  ;;  %v293_v28 = vsub.s32 %v290_v22, %v280_v19  ;;  %v300_v31 = vsub.s32 %v297_v23, %v280_v19  ;;  %v379_v48 = vld [vmem:[%s1031_s4] sm:$0x1]  ;;  %s712_s8 = scalar_lea.vmem %s977_s12, 1024  ;;  %p1041_p12 = scmp.ne.s32.totalorder %s1037_s30, 0 }
  0x3c   : > { %255 = vadd.xlane.f32.xlu0 %v254_v10  ;;  %615 = vmatpush3.msra.mxu0 %v270_v14  ;;  %p713_p11 = scmp.ne.s32.totalorder %s977_s12, %s712_s8  ;;  %s783_s7 = smov [#allocation5]  }
  0x3d   : > { %261 = vadd.xlane.f32.xlu1 %v260_v11  ;;  %616 = vmatprep.subr.mxu0 %v781_v12  ;;  %s716_s9 = sshll.u32 %s783_s7, 4  ;;  %s717_s9 = int_to_ptr.vmem [resolvable:$false] %s716_s9 }
  0x3e   : > { %617 = vmatpush3.msra.mxu0 %v269_v15  ;;  %p714_p13 = pnand %p713_p11, %p1041_p12  ;;  %s718_s10 = scalar_lea.vmem %s717_s9, 2048 }
  0x3f   : > { %618 = vmatprep.subr.mxu0 %v781_v12  ;;  %p719_p5 = scmp.lt.s32.totalorder %s977_s12, %s717_s9  ;;  %p720_p7 = scmp.lt.s32.totalorder %s718_s10, %s712_s8 }
  0x40   : > { %619 = vmatpush3.msra.mxu0 %v268_v16  ;;  %p715_p4 = pneg %p714_p13 }
  0x41   : > { %p721_p8 = por %p720_p7, %p719_p5 }
  0x43   : > { %p722_p10 = pnand %p721_p8, %p715_p4 }
  0xc1   : > { %v253_v21 = vpop.xlane.xlu0 %252 }
  0xc2   : > { %v259_v24 = vpop.xlane.xlu1 %258  ;;  %v264_v26 = vmul.f32 0.00390625, %v253_v21 }
  0xc3   : > { %v266_v29 = vmul.f32 0.00390625, %v259_v24 }
  0xc4   : > { %v282_v35 = vrot.slane %v264_v26, %v281_v25 }
  0xc5   : > { %v256_v30 = vpop.xlane.xlu0 %255  ;;  %v294_v37 = vrot.slane %v266_v29, %v293_v28 }
  0xc6   : > { %v265_v32 = vmul.f32 0.00390625, %v256_v30  ;;  %v262_v33 = vpop.xlane.xlu1 %261 }
  0xc7   : > { %v267_v34 = vmul.f32 0.00390625, %v262_v33 }
  0xc8   : > { %v287_v36 = vrot.slane %v265_v32, %v286_v27 }
  0xc9   : > { %v301_v38 = vrot.slane %v267_v34, %v300_v31 }
  0xca   : > { %v289_v39 = vsel %vm288_vm1, %v287_v36, %v282_v35 }
  0xcb   : > { %v296_v40 = vsel %vm295_vm2, %v294_v37, %v289_v39 }
  0xcc   : > { %v303_v41 = vsel %vm302_vm3, %v301_v38, %v296_v40 }
  0xcd   : > { %621 = vmatmul.mubr.msk.f32.vlgmr.msra.gmra.mxu0 %vm304_vm4, %v303_v41 }
 0x18d   : > { %v373_v44 = vpop.f32.mrf.mxu0 }
 0x18e   : > { %v374_v45 = vadd.f32 %v373_v44, %v272_v43 }
 0x18f   : > { %v622_v46 = vpop.f32.mrf.mxu0 }
 0x190   : > { %v377_v47 = vmax.f32 %v374_v45, 0.0 }
 0x192   : > { %626 = vmatmul.mubr.msk.f32.vlgmr.msra.gmra.mxu1 %vm380_vm6, %v377_v47 }
 0x252   : > { %v454_v49 = vpop.f32.mrf.mxu1 }
 0x253   : > { %v455_v50 = vadd.f32 %v454_v49, %v379_v48 }
 0x254   : > { %v627_v51 = vpop.f32.mrf.mxu1 }
 0x255   : > { %v458_v52 = vsub.f32 0.0, %v455_v50 }
 0x257   : > { %v459_v53 = vmul.f32 1.442695, %v458_v52 }
 0x259   : > { %680 = vpow2.f32 %v459_v53 }
 0x266   : > { %v681_v54 = vpop.eup %680 }
 0x267   : > { %v461_v55 = vadd.f32 1.0, %v681_v54 }
 0x269   : > { %682 = vrcp.f32 %v461_v55 }
 0x276   : > { %v683_v57 = vpop.eup %682 }
 0x277   : > { %v467_v58 = vrot.slane %v683_v57, %v466_v56 }
 0x279   : > { %473 = vbcast.lane.b32.xlu1 %v467_v58, 264  ;;  %469 = vbcast.lane.b32.xlu0 %v467_v58, 256 }
 0x27d   : > { %477 = vbcast.lane.b32.xlu1 %v467_v58, 272 }
 0x281   : > { %481 = vbcast.lane.b32.xlu1 %v467_v58, 280 }
 0x2eb   : > { %v474_v59 = vpop.permute.xlu1 %473  ;;  %v470_v60 = vpop.permute.xlu0 %469 }
 0x2ec   : > { %v485_v61 = vmul.f32 %v474_v59, %v933_v5  ;;  %v486_v62 = vmul.f32 %v474_v59, %v935_v6  ;;  %v483_v63 = vmul.f32 %v470_v60, %v923_v0  ;;  %v484_v3 = vmul.f32 %v470_v60, %v925_v1 }
 0x2ee   : > { %493 = vst [vmem:[%s242_s29 + $0x10] sm:$0xff] %v485_v61  ;;  %494 = vst [vmem:[%s242_s29 + $0x18] sm:$0xff] %v486_v62 }
 0x2ef   : > { %491 = vst [vmem:[%s242_s29] sm:$0xff] %v483_v63  ;;  %492 = vst [vmem:[%s242_s29 + $0x8] sm:$0xff] %v484_v3  ;;  %v478_v7 = vpop.permute.xlu1 %477 }
 0x2f0   : > { %v487_v10 = vmul.f32 %v478_v7, %v927_v2  ;;  %v488_v5 = vmul.f32 %v478_v7, %v931_v4 }
 0x2f2   : > { %495 = vst [vmem:[%s242_s29 + $0x20] sm:$0xff] %v487_v10  ;;  %496 = vst [vmem:[%s242_s29 + $0x28] sm:$0xff] %v488_v5 }
 0x2f3   : > { %v482_v0 = vpop.permute.xlu1 %481 }
 0x2f4   : > { %v489_v1 = vmul.f32 %v482_v0, %v939_v8  ;;  %v490_v2 = vmul.f32 %v482_v0, %v941_v9 }
 0x2f6   : > { %497 = vst [vmem:[%s242_s29 + $0x30] sm:$0xff] %v489_v1  ;;  %498 = vst [vmem:[%s242_s29 + $0x38] sm:$0xff] %v490_v2 }
 0x2f7   : > { %725 = shalt.err (!%p722_p10)
}
 0x2f8   : > { %s726_s11 = scalar_lea.hbm %s982_s16, 1024  ;;  %s730_s26 = scalar_lea.hbm %s1032_s5, 2048 }
 0x2f9   : > { %p727_p0 = scmp.ne.s32.totalorder %s982_s16, %s726_s11  ;;  %p731_p1 = scmp.lt.s32.totalorder %s982_s16, %s1032_s5 }
 0x2fa   : > { %p732_p3 = scmp.lt.s32.totalorder %s730_s26, %s726_s11 }
 0x2fb   : > { %p728_p2 = pnand %p727_p0, %p1041_p12 }
 0x2fc   : > { %p733_p6 = por %p732_p3, %p731_p1 }
 0x2fd   : > { %p729_p9 = pneg %p728_p2 }
 0x2ff   : > { %p734_p11 = pnand %p733_p6, %p729_p9 }
 0x301   : > { %737 = shalt.err (!%p734_p11)
}
 0x302   : > { %s784_s14 = smov 256   ;;  %s785_s25 = smov 16  }
 0x303   : > { %630 = dma.vmem_to_hbm [thread:$0]  (%p1041_p12), %s977_s12, 1024, %s982_s16, %s500_s22, %s784_s14, %s784_s14, %s785_s25  }
 0x304 PF: > { %s528_s15 = sand.u32 1, %s764_s18   ;;  %p1042_p13 = scmp.ne.s32.totalorder %s1038_s6, 0 }
 0x305   : > { %p1043_p4 = scmp.ge.s32.totalorder %s776_s21, 2  ;;  %s529_s8 = scalar_lea.sflag [#allocation4], %s528_s15 }
 0x307   : > { %p637_p5 = pnand %p1043_p4, %p1042_p13 }
 0x309   : > { %p638_p7 = pneg %p637_p5 }
 0x30b   : > { %759 = dma.done.wait (%p638_p7), %s529_s8, 1024  }
 0x30c   : > { %761 = vsyncadd (%p638_p7), %s529_s8, 4294966272  ;;  %p18_p8 = scmp.ge.s32.totalorder %s841_s24, 4   ;;  %s1044_s18 = smov %s768_s19 }
 0x30d   : > { %s1045_s19 = smov %s772_s20  ;;  %s1046_s20 = smov %s853_s27 }
 0x30e   : > { %s1047_s21 = smov %s841_s24  ;;  %20 = sbr.rel (!%p18_p8) target bundleno = 5 (0x5), region = 85 }
 0x313   :  { %534 = vsyncpa [#allocation3], 1 }
 0x314   :  { %536 = vsyncpa [#allocation3 + $0x1], 1 }
 0x315   :  { %537 = vsyncpa [#allocation4], 1 }
 0x316   :  { %539 = vsyncpa [#allocation4 + $0x1], 1 }

</bundles_post_ra>
